<compile_context>
chip_gen: v7x
topology: tpu7x:2x2x1
jax: 0.10.0
libtpu: 0.0.40
codegen_flags: <defaults>
</compile_context>

<pallas_src>
import functools

import jax
import jax.numpy as jnp
from jax import lax
from jax.experimental import pallas as pl
from jax.experimental.pallas import tpu as pltpu


# ----------------------------------------------------------------------------
# Fused Pallas kernel: (policy + value) x (GAT layer1 -> ReLU -> GAT layer2)
# for one graph; grid iterates over the batch.
# ----------------------------------------------------------------------------
def fused_gat_policy_value_kernel(x_ref, adj_ref, edge_ref, w1_ref, asrc1_ref,
                                  adst1_ref, b1_ref, w2_ref, scal_ref,
                                  pi_ref, vf_ref, *, emb):
    x = x_ref[...].astype(jnp.float32)          # (N, Fin)
    adj = adj_ref[...]                          # (N, N), {0,1}, self-loops included
    ea = edge_ref[...]                          # (N, N) scalar edge attrs

    # ---- shared layer-1 projection: one 256-wide MXU pass for policy|value ----
    xl = jnp.dot(x, w1_ref[...], preferred_element_type=jnp.float32)       # (N, 2*emb)

    # <xl_i, att_src> for both branches in one dot (block-structured att rows).
    a_src_all = lax.dot_general(asrc1_ref[...], xl, (((1,), (1,)), ((), ())),
                                preferred_element_type=jnp.float32)        # (2, N)

    out_refs = (pi_ref, vf_ref)
    for br in range(2):                          # 0 = policy, 1 = value (unrolled)
        lo, hi = br * emb, (br + 1) * emb
        xl_b = xl[:, lo:hi]                      # (N, emb), 128-lane aligned slice

        # ---------------- layer 1: dense masked GAT attention ----------------
        a_s = a_src_all[br:br + 1, :]                                        # (1, N)
        a_d = jnp.sum(xl_b * adst1_ref[br:br + 1, lo:hi],
                      axis=-1, keepdims=True)                                # (N, 1)
        ecoef1 = scal_ref[br, 0]                 # lin_edge . att_edge (edge_dim=1)
        logits = a_d + a_s + ea * ecoef1                                     # (N, N)
        logits = jnp.where(logits >= 0.0, logits, 0.2 * logits)              # LeakyReLU(0.2)
        masked = jnp.where(adj > 0.0, logits, jnp.float32(-1e30))
        m = jnp.max(masked, axis=-1, keepdims=True)
        p = jnp.exp(masked - m) * adj
        denom = jnp.maximum(jnp.sum(p, axis=-1, keepdims=True), 1e-20)
        inv_denom = pl.reciprocal(denom, approx=True)                        # EUP
        # deferred normalization: (p @ xl) * 1/denom, then bias, then ReLU
        h = jnp.dot(p, xl_b, preferred_element_type=jnp.float32) * inv_denom
        h = jnp.maximum(h + b1_ref[:, lo:hi], 0.0)                           # (N, emb)

        # ------------- layer 2 (out_channels = 1): no 1-wide MXU ops ----------
        w2_b = w2_ref[:, lo:hi]                                              # (1, emb)
        xl2_col = jnp.sum(h * w2_b, axis=-1, keepdims=True)                  # (N, 1) VPU+XLU
        xl2_row = lax.dot_general(w2_b, h, (((1,), (1,)), ((), ())),
                                  preferred_element_type=jnp.float32)        # (1, N) lane-dense
        ecoef2 = scal_ref[br, 1]
        asrc2 = scal_ref[br, 2]
        adst2 = scal_ref[br, 3]
        bias2 = scal_ref[br, 4]
        logits2 = adst2 * xl2_col + asrc2 * xl2_row + ea * ecoef2            # (N, N)
        logits2 = jnp.where(logits2 >= 0.0, logits2, 0.2 * logits2)
        masked2 = jnp.where(adj > 0.0, logits2, jnp.float32(-1e30))
        m2 = jnp.max(masked2, axis=-1, keepdims=True)
        p2 = jnp.exp(masked2 - m2) * adj
        denom2 = jnp.maximum(jnp.sum(p2, axis=-1, keepdims=True), 1e-20)
        alpha2 = p2 * pl.reciprocal(denom2, approx=True)                     # (N, N)
        # out[j] = sum_i alpha2[j,i] * xl2[i] + bias  -> produced as a (1, N) row
        out_row = lax.dot_general(xl2_row, alpha2, (((1,), (1,)), ((), ())),
                                  preferred_element_type=jnp.float32) + bias2
        out_refs[br][...] = out_row.astype(out_refs[br].dtype)


# ----------------------------------------------------------------------------
# Host wrapper: pack policy+value params and launch the fused kernel
# ----------------------------------------------------------------------------
def pack_params(policy_params, value_params, emb):
    p1, v1 = policy_params["layer1"], value_params["layer1"]
    p2, v2 = policy_params["layer2"], value_params["layer2"]

    w1 = jnp.concatenate([p1["w"], v1["w"]], axis=1)                 # (Fin, 2*emb)
    b1 = jnp.concatenate([p1["bias"], v1["bias"]], axis=1)           # (1, 2*emb)

    asrc1 = jnp.zeros((2, 2 * emb), jnp.float32)                     # block-structured
    asrc1 = asrc1.at[0, :emb].set(p1["att_src"][0])
    asrc1 = asrc1.at[1, emb:].set(v1["att_src"][0])
    adst1 = jnp.zeros((2, 2 * emb), jnp.float32)
    adst1 = adst1.at[0, :emb].set(p1["att_dst"][0])
    adst1 = adst1.at[1, emb:].set(v1["att_dst"][0])

    w2 = jnp.concatenate([p2["w"].reshape(1, emb),
                          v2["w"].reshape(1, emb)], axis=1)          # (1, 2*emb)

    def branch_scalars(l1, l2):
        return jnp.array([l1["ecoef"][0, 0], l2["ecoef"][0, 0],
                          l2["att_src"][0, 0], l2["att_dst"][0, 0],
                          l2["bias"][0, 0], 0.0, 0.0, 0.0], jnp.float32)

    scal = jnp.stack([branch_scalars(p1, p2), branch_scalars(v1, v2)])  # (2, 8) -> SMEM
    return w1, asrc1, adst1, b1, w2, scal


def custom_policy_and_value_forward(x, adj, edge, policy_params, value_params,
                                    embedding_dim=128):
    B, N, fin = x.shape
    emb = embedding_dim
    w1, asrc1, adst1, b1, w2, scal = pack_params(policy_params, value_params, emb)
    kernel = functools.partial(fused_gat_policy_value_kernel, emb=emb)

    pi, vf = pl.pallas_call(
        kernel,
        out_shape=(jax.ShapeDtypeStruct((B, 1, N), jnp.float32),
                   jax.ShapeDtypeStruct((B, 1, N), jnp.float32)),
        grid=(B,),
        in_specs=[
            pl.BlockSpec((None, N, fin), lambda b: (b, 0, 0)),        # x
            pl.BlockSpec((None, N, N),   lambda b: (b, 0, 0)),        # adjacency mask
            pl.BlockSpec((None, N, N),   lambda b: (b, 0, 0)),        # edge attrs
            pl.BlockSpec((fin, 2 * emb), lambda b: (0, 0)),           # W1 (policy|value)
            pl.BlockSpec((2, 2 * emb),   lambda b: (0, 0)),           # att_src rows
            pl.BlockSpec((2, 2 * emb),   lambda b: (0, 0)),           # att_dst rows
            pl.BlockSpec((1, 2 * emb),   lambda b: (0, 0)),           # bias1 (policy|value)
            pl.BlockSpec((1, 2 * emb),   lambda b: (0, 0)),           # W2 rows (policy|value)
            pl.BlockSpec(memory_space=pltpu.MemorySpace.SMEM),        # per-branch scalars
        ],
        out_specs=(
            pl.BlockSpec((None, 1, N), lambda b: (b, 0, 0)),          # policy latent
            pl.BlockSpec((None, 1, N), lambda b: (b, 0, 0)),          # value latent
        ),
        compiler_params=pltpu.CompilerParams(
            dimension_semantics=("parallel",)),
    )(x, adj, edge, w1, asrc1, adst1, b1, w2, scal)

    # nn.Flatten(): (B, N*1) per head.
    return pi.reshape(B, N), vf.reshape(B, N)


# ----------------------------------------------------------------------------
# Deterministic parameter / input construction (synthetic, no checkpoint)
# ----------------------------------------------------------------------------
def init_gat_layer(key, fin, fout):
    ks = jax.random.split(key, 5)
    w = jax.random.normal(ks[0], (fin, fout), jnp.float32) / jnp.sqrt(float(fin))
    att_src = 0.1 * jax.random.normal(ks[1], (1, fout), jnp.float32)
    att_dst = 0.1 * jax.random.normal(ks[2], (1, fout), jnp.float32)
    w_edge = 0.1 * jax.random.normal(ks[3], (fout,), jnp.float32)   # lin_edge (edge_dim=1)
    att_edge = 0.1 * jax.random.normal(ks[4], (fout,), jnp.float32)
    ecoef = jnp.sum(w_edge * att_edge).reshape(1, 1)
    bias = jnp.zeros((1, fout), jnp.float32)
    return dict(w=w, att_src=att_src, att_dst=att_dst, ecoef=ecoef, bias=bias)


def init_gatconvnet(key, fin, embedding_dim):
    k1, k2 = jax.random.split(key)
    return {"layer1": init_gat_layer(k1, fin, embedding_dim),
            "layer2": init_gat_layer(k2, embedding_dim, 1)}


def make_graph(key, B, N):
    # Ring graph (undirected) + self loops; PyG fill_value='mean' for self-loop attrs.
    idx = jnp.arange(N)
    adj = jnp.zeros((N, N), jnp.float32)
    adj = adj.at[idx, (idx + 1) % N].set(1.0)
    adj = adj.at[(idx + 1) % N, idx].set(1.0)
    adj = jnp.broadcast_to(adj, (B, N, N))
    ea = jax.random.uniform(key, (B, N, N), jnp.float32) * adj
    n_edges = jnp.sum(adj, axis=(1, 2), keepdims=True)
    mean_ea = jnp.sum(ea, axis=(1, 2), keepdims=True) / n_edges
    eye = jnp.eye(N, dtype=jnp.float32)[None]
    return adj + eye, ea + eye * mean_ea


if __name__ == "__main__":
    B = 2                 # batch of graphs
    N = 16                # p_net_num_nodes
    FEATURES_DIM = 4      # features_dim (per-node input features)
    EMB = 128             # embedding_dim

    key = jax.random.PRNGKey(0)
    kx, kg, kp, kv = jax.random.split(key, 4)

    x = jax.random.normal(kx, (B, N, FEATURES_DIM), jnp.float32)
    adj, edge = make_graph(kg, B, N)

    policy_params = init_gatconvnet(kp, FEATURES_DIM, EMB)
    value_params = init_gatconvnet(kv, FEATURES_DIM, EMB)

    fwd = jax.jit(functools.partial(custom_policy_and_value_forward,
                                    embedding_dim=EMB))
    pi, vf = fwd(x, adj, edge, policy_params, value_params)
    pi, vf = jax.block_until_ready((pi, vf))

    assert pi.shape == (B, N), pi.shape     # latent_dim_pi = p_net_num_nodes
    assert vf.shape == (B, N), vf.shape     # latent_dim_vf = p_net_num_nodes
    assert bool(jnp.all(jnp.isfinite(pi))) and bool(jnp.all(jnp.isfinite(vf)))
    print("KERNEL_OK")
</pallas_src>

<mosaic_0001>
module attributes {stable_mosaic.version = 11 : i64} {
  func.func @fused_gat_policy_value_kernel(%arg0: i32, %arg1: memref<1x16x4xf32, #tpu.memory_space<vmem>>, %arg2: memref<1x16x16xf32, #tpu.memory_space<vmem>>, %arg3: memref<1x16x16xf32, #tpu.memory_space<vmem>>, %arg4: memref<4x256xf32, #tpu.memory_space<vmem>>, %arg5: memref<2x256xf32, #tpu.memory_space<vmem>>, %arg6: memref<2x256xf32, #tpu.memory_space<vmem>>, %arg7: memref<1x256xf32, #tpu.memory_space<vmem>>, %arg8: memref<1x256xf32, #tpu.memory_space<vmem>>, %arg9: memref<2x8xf32, #tpu.memory_space<smem>>, %arg10: memref<1x1x16xf32, #tpu.memory_space<vmem>>, %arg11: memref<1x1x16xf32, #tpu.memory_space<vmem>>) attributes {dimension_semantics = [#tpu.dimension_semantics<parallel>], iteration_bounds = array<i64: 2>, scalar_prefetch = 0 : i64, scratch_operands = 0 : i64, tpu.core_type = #tpu.core_type<tc>, window_params = [{transform_indices = @transform_0, window_bounds = array<i64: 1, 16, 4>}, {transform_indices = @transform_1, window_bounds = array<i64: 1, 16, 16>}, {transform_indices = @transform_2, window_bounds = array<i64: 1, 16, 16>}, {pipeline_mode = #tpu.pipeline_mode<synchronous>, transform_indices = @transform_3, window_bounds = array<i64: 4, 256>}, {pipeline_mode = #tpu.pipeline_mode<synchronous>, transform_indices = @transform_4, window_bounds = array<i64: 2, 256>}, {pipeline_mode = #tpu.pipeline_mode<synchronous>, transform_indices = @transform_5, window_bounds = array<i64: 2, 256>}, {pipeline_mode = #tpu.pipeline_mode<synchronous>, transform_indices = @transform_6, window_bounds = array<i64: 1, 256>}, {pipeline_mode = #tpu.pipeline_mode<synchronous>, transform_indices = @transform_7, window_bounds = array<i64: 1, 256>}, {transform_indices = @transform_8, window_bounds = array<i64: 2, 8>}, {transform_indices = @transform_9, window_bounds = array<i64: 1, 1, 16>}, {transform_indices = @transform_10, window_bounds = array<i64: 1, 1, 16>}]} {
    %c0 = arith.constant 0 : index
    %c0_0 = arith.constant 0 : index
    %c0_1 = arith.constant 0 : index
    %0 = vector.load %arg1[%c0, %c0_0, %c0_1] : memref<1x16x4xf32, #tpu.memory_space<vmem>>, vector<1x16x4xf32>
    %1 = vector.shape_cast %0 : vector<1x16x4xf32> to vector<16x4xf32>
    %c0_2 = arith.constant 0 : index
    %c0_3 = arith.constant 0 : index
    %c0_4 = arith.constant 0 : index
    %2 = vector.load %arg2[%c0_2, %c0_3, %c0_4] : memref<1x16x16xf32, #tpu.memory_space<vmem>>, vector<1x16x16xf32>
    %3 = vector.shape_cast %2 : vector<1x16x16xf32> to vector<16x16xf32>
    %c0_5 = arith.constant 0 : index
    %c0_6 = arith.constant 0 : index
    %c0_7 = arith.constant 0 : index
    %4 = vector.load %arg3[%c0_5, %c0_6, %c0_7] : memref<1x16x16xf32, #tpu.memory_space<vmem>>, vector<1x16x16xf32>
    %5 = vector.shape_cast %4 : vector<1x16x16xf32> to vector<16x16xf32>
    %c0_8 = arith.constant 0 : index
    %c0_9 = arith.constant 0 : index
    %6 = vector.load %arg4[%c0_8, %c0_9] : memref<4x256xf32, #tpu.memory_space<vmem>>, vector<4x256xf32>
    %cst = arith.constant dense<0.000000e+00> : vector<16x256xf32>
    %7 = tpu.matmul %1, %6, %cst {dimension_numbers = #tpu.dot_dimension_numbers<[1], [0], [0], [1], [0, 0, 1, 1], [], []>} : vector<16x4xf32>, vector<4x256xf32>, vector<16x256xf32> -> vector<16x256xf32>
    %c0_10 = arith.constant 0 : index
    %c0_11 = arith.constant 0 : index
    %8 = vector.load %arg5[%c0_10, %c0_11] : memref<2x256xf32, #tpu.memory_space<vmem>>, vector<2x256xf32>
    %cst_12 = arith.constant dense<0.000000e+00> : vector<2x16xf32>
    %9 = tpu.matmul %8, %7, %cst_12 {dimension_numbers = #tpu.dot_dimension_numbers<[1], [1], [0], [0], [0, 0, 1, 0], [], []>} : vector<2x256xf32>, vector<16x256xf32>, vector<2x16xf32> -> vector<2x16xf32>
    %10 = vector.extract_strided_slice %7 {offsets = [0, 0], sizes = [16, 128], strides = [1, 1]} : vector<16x256xf32> to vector<16x128xf32>
    %11 = vector.extract_strided_slice %9 {offsets = [0, 0], sizes = [1, 16], strides = [1, 1]} : vector<2x16xf32> to vector<1x16xf32>
    %c0_13 = arith.constant 0 : index
    %c0_14 = arith.constant 0 : index
    %12 = vector.load %arg6[%c0_13, %c0_14] : memref<2x256xf32, #tpu.memory_space<vmem>>, vector<1x128xf32>
    %13 = vector.broadcast %12 : vector<1x128xf32> to vector<16x128xf32>
    %14 = arith.mulf %10, %13 : vector<16x128xf32>
    %cst_15 = arith.constant dense<0.000000e+00> : vector<16xf32>
    %15 = vector.multi_reduction <add>, %14, %cst_15 [1] : vector<16x128xf32> to vector<16xf32>
    %16 = vector.shape_cast %15 : vector<16xf32> to vector<16x1xf32>
    %c0_16 = arith.constant 0 : index
    %c0_17 = arith.constant 0 : index
    %17 = memref.load %arg9[%c0_16, %c0_17] : memref<2x8xf32, #tpu.memory_space<smem>>
    %18 = vector.broadcast %16 : vector<16x1xf32> to vector<16x16xf32>
    %19 = vector.broadcast %11 : vector<1x16xf32> to vector<16x16xf32>
    %20 = arith.addf %18, %19 : vector<16x16xf32>
    %21 = vector.broadcast %17 : f32 to vector<16x16xf32>
    %22 = arith.mulf %5, %21 : vector<16x16xf32>
    %23 = arith.addf %20, %22 : vector<16x16xf32>
    %cst_18 = arith.constant 0.000000e+00 : f32
    %24 = vector.broadcast %cst_18 : f32 to vector<16x16xf32>
    %25 = arith.cmpf oge, %23, %24 : vector<16x16xf32>
    %cst_19 = arith.constant 2.000000e-01 : f32
    %26 = vector.broadcast %cst_19 : f32 to vector<16x16xf32>
    %27 = arith.mulf %26, %23 : vector<16x16xf32>
    %28 = arith.select %25, %23, %27 : vector<16x16xi1>, vector<16x16xf32>
    %cst_20 = arith.constant 0.000000e+00 : f32
    %29 = vector.broadcast %cst_20 : f32 to vector<16x16xf32>
    %30 = arith.cmpf ogt, %3, %29 : vector<16x16xf32>
    %cst_21 = arith.constant -1.000000e+30 : f32
    %31 = vector.broadcast %cst_21 : f32 to vector<16x16xf32>
    %32 = arith.select %30, %28, %31 : vector<16x16xi1>, vector<16x16xf32>
    %cst_22 = arith.constant dense<0xFF800000> : vector<16xf32>
    %33 = vector.multi_reduction <maximumf>, %32, %cst_22 [1] : vector<16x16xf32> to vector<16xf32>
    %34 = vector.shape_cast %33 : vector<16xf32> to vector<16x1xf32>
    %35 = vector.broadcast %34 : vector<16x1xf32> to vector<16x16xf32>
    %36 = arith.subf %32, %35 : vector<16x16xf32>
    %37 = math.exp %36 : vector<16x16xf32>
    %38 = arith.mulf %37, %3 : vector<16x16xf32>
    %cst_23 = arith.constant dense<0.000000e+00> : vector<16xf32>
    %39 = vector.multi_reduction <add>, %38, %cst_23 [1] : vector<16x16xf32> to vector<16xf32>
    %40 = vector.shape_cast %39 : vector<16xf32> to vector<16x1xf32>
    %cst_24 = arith.constant 9.99999968E-21 : f32
    %41 = vector.broadcast %cst_24 : f32 to vector<16x1xf32>
    %42 = arith.maximumf %40, %41 : vector<16x1xf32>
    %43 = tpu.reciprocal %42 {approx = true} : vector<16x1xf32> -> vector<16x1xf32>
    %cst_25 = arith.constant dense<0.000000e+00> : vector<16x128xf32>
    %44 = tpu.matmul %38, %10, %cst_25 {dimension_numbers = #tpu.dot_dimension_numbers<[1], [0], [0], [1], [0, 0, 1, 1], [], []>} : vector<16x16xf32>, vector<16x128xf32>, vector<16x128xf32> -> vector<16x128xf32>
    %45 = vector.broadcast %43 : vector<16x1xf32> to vector<16x128xf32>
    %46 = arith.mulf %44, %45 : vector<16x128xf32>
    %c0_26 = arith.constant 0 : index
    %c0_27 = arith.constant 0 : index
    %47 = vector.load %arg7[%c0_26, %c0_27] : memref<1x256xf32, #tpu.memory_space<vmem>>, vector<1x128xf32>
    %48 = vector.broadcast %47 : vector<1x128xf32> to vector<16x128xf32>
    %49 = arith.addf %46, %48 : vector<16x128xf32>
    %cst_28 = arith.constant 0.000000e+00 : f32
    %50 = vector.broadcast %cst_28 : f32 to vector<16x128xf32>
    %51 = arith.maximumf %49, %50 : vector<16x128xf32>
    %c0_29 = arith.constant 0 : index
    %c0_30 = arith.constant 0 : index
    %52 = vector.load %arg8[%c0_29, %c0_30] : memref<1x256xf32, #tpu.memory_space<vmem>>, vector<1x128xf32>
    %53 = vector.broadcast %52 : vector<1x128xf32> to vector<16x128xf32>
    %54 = arith.mulf %51, %53 : vector<16x128xf32>
    %cst_31 = arith.constant dense<0.000000e+00> : vector<16xf32>
    %55 = vector.multi_reduction <add>, %54, %cst_31 [1] : vector<16x128xf32> to vector<16xf32>
    %56 = vector.shape_cast %55 : vector<16xf32> to vector<16x1xf32>
    %cst_32 = arith.constant dense<0.000000e+00> : vector<1x16xf32>
    %57 = tpu.matmul %52, %51, %cst_32 {dimension_numbers = #tpu.dot_dimension_numbers<[1], [1], [0], [0], [0, 0, 1, 0], [], []>} : vector<1x128xf32>, vector<16x128xf32>, vector<1x16xf32> -> vector<1x16xf32>
    %c0_33 = arith.constant 0 : index
    %c1 = arith.constant 1 : index
    %58 = memref.load %arg9[%c0_33, %c1] : memref<2x8xf32, #tpu.memory_space<smem>>
    %c0_34 = arith.constant 0 : index
    %c2 = arith.constant 2 : index
    %59 = memref.load %arg9[%c0_34, %c2] : memref<2x8xf32, #tpu.memory_space<smem>>
    %c0_35 = arith.constant 0 : index
    %c3 = arith.constant 3 : index
    %60 = memref.load %arg9[%c0_35, %c3] : memref<2x8xf32, #tpu.memory_space<smem>>
    %c0_36 = arith.constant 0 : index
    %c4 = arith.constant 4 : index
    %61 = memref.load %arg9[%c0_36, %c4] : memref<2x8xf32, #tpu.memory_space<smem>>
    %62 = vector.broadcast %60 : f32 to vector<16x1xf32>
    %63 = arith.mulf %62, %56 : vector<16x1xf32>
    %64 = vector.broadcast %59 : f32 to vector<1x16xf32>
    %65 = arith.mulf %64, %57 : vector<1x16xf32>
    %66 = vector.broadcast %63 : vector<16x1xf32> to vector<16x16xf32>
    %67 = vector.broadcast %65 : vector<1x16xf32> to vector<16x16xf32>
    %68 = arith.addf %66, %67 : vector<16x16xf32>
    %69 = vector.broadcast %58 : f32 to vector<16x16xf32>
    %70 = arith.mulf %5, %69 : vector<16x16xf32>
    %71 = arith.addf %68, %70 : vector<16x16xf32>
    %cst_37 = arith.constant 0.000000e+00 : f32
    %72 = vector.broadcast %cst_37 : f32 to vector<16x16xf32>
    %73 = arith.cmpf oge, %71, %72 : vector<16x16xf32>
    %cst_38 = arith.constant 2.000000e-01 : f32
    %74 = vector.broadcast %cst_38 : f32 to vector<16x16xf32>
    %75 = arith.mulf %74, %71 : vector<16x16xf32>
    %76 = arith.select %73, %71, %75 : vector<16x16xi1>, vector<16x16xf32>
    %cst_39 = arith.constant 0.000000e+00 : f32
    %77 = vector.broadcast %cst_39 : f32 to vector<16x16xf32>
    %78 = arith.cmpf ogt, %3, %77 : vector<16x16xf32>
    %cst_40 = arith.constant -1.000000e+30 : f32
    %79 = vector.broadcast %cst_40 : f32 to vector<16x16xf32>
    %80 = arith.select %78, %76, %79 : vector<16x16xi1>, vector<16x16xf32>
    %cst_41 = arith.constant dense<0xFF800000> : vector<16xf32>
    %81 = vector.multi_reduction <maximumf>, %80, %cst_41 [1] : vector<16x16xf32> to vector<16xf32>
    %82 = vector.shape_cast %81 : vector<16xf32> to vector<16x1xf32>
    %83 = vector.broadcast %82 : vector<16x1xf32> to vector<16x16xf32>
    %84 = arith.subf %80, %83 : vector<16x16xf32>
    %85 = math.exp %84 : vector<16x16xf32>
    %86 = arith.mulf %85, %3 : vector<16x16xf32>
    %cst_42 = arith.constant dense<0.000000e+00> : vector<16xf32>
    %87 = vector.multi_reduction <add>, %86, %cst_42 [1] : vector<16x16xf32> to vector<16xf32>
    %88 = vector.shape_cast %87 : vector<16xf32> to vector<16x1xf32>
    %cst_43 = arith.constant 9.99999968E-21 : f32
    %89 = vector.broadcast %cst_43 : f32 to vector<16x1xf32>
    %90 = arith.maximumf %88, %89 : vector<16x1xf32>
    %91 = tpu.reciprocal %90 {approx = true} : vector<16x1xf32> -> vector<16x1xf32>
    %92 = vector.broadcast %91 : vector<16x1xf32> to vector<16x16xf32>
    %93 = arith.mulf %86, %92 : vector<16x16xf32>
    %cst_44 = arith.constant dense<0.000000e+00> : vector<1x16xf32>
    %94 = tpu.matmul %57, %93, %cst_44 {dimension_numbers = #tpu.dot_dimension_numbers<[1], [1], [0], [0], [0, 0, 1, 0], [], []>} : vector<1x16xf32>, vector<16x16xf32>, vector<1x16xf32> -> vector<1x16xf32>
    %95 = vector.broadcast %61 : f32 to vector<1x16xf32>
    %96 = arith.addf %94, %95 : vector<1x16xf32>
    %c0_45 = arith.constant 0 : index
    %c0_46 = arith.constant 0 : index
    %c0_47 = arith.constant 0 : index
    %97 = vector.load %arg10[%c0_45, %c0_46, %c0_47] : memref<1x1x16xf32, #tpu.memory_space<vmem>>, vector<1x1x16xf32>
    %98 = vector.shape_cast %97 : vector<1x1x16xf32> to vector<1x16xf32>
    %99 = vector.shape_cast %96 : vector<1x16xf32> to vector<1x1x16xf32>
    tpu.vector_store %arg10[%c0_45, %c0_46, %c0_47], %99 {strides = array<i32>} : memref<1x1x16xf32, #tpu.memory_space<vmem>>, vector<1x1x16xf32>,
    %100 = vector.extract_strided_slice %7 {offsets = [0, 128], sizes = [16, 128], strides = [1, 1]} : vector<16x256xf32> to vector<16x128xf32>
    %101 = vector.extract_strided_slice %9 {offsets = [1, 0], sizes = [1, 16], strides = [1, 1]} : vector<2x16xf32> to vector<1x16xf32>
    %c1_48 = arith.constant 1 : index
    %c128 = arith.constant 128 : index
    %102 = vector.load %arg6[%c1_48, %c128] : memref<2x256xf32, #tpu.memory_space<vmem>>, vector<1x128xf32>
    %103 = vector.broadcast %102 : vector<1x128xf32> to vector<16x128xf32>
    %104 = arith.mulf %100, %103 : vector<16x128xf32>
    %cst_49 = arith.constant dense<0.000000e+00> : vector<16xf32>
    %105 = vector.multi_reduction <add>, %104, %cst_49 [1] : vector<16x128xf32> to vector<16xf32>
    %106 = vector.shape_cast %105 : vector<16xf32> to vector<16x1xf32>
    %c1_50 = arith.constant 1 : index
    %c0_51 = arith.constant 0 : index
    %107 = memref.load %arg9[%c1_50, %c0_51] : memref<2x8xf32, #tpu.memory_space<smem>>
    %108 = vector.broadcast %106 : vector<16x1xf32> to vector<16x16xf32>
    %109 = vector.broadcast %101 : vector<1x16xf32> to vector<16x16xf32>
    %110 = arith.addf %108, %109 : vector<16x16xf32>
    %111 = vector.broadcast %107 : f32 to vector<16x16xf32>
    %112 = arith.mulf %5, %111 : vector<16x16xf32>
    %113 = arith.addf %110, %112 : vector<16x16xf32>
    %cst_52 = arith.constant 0.000000e+00 : f32
    %114 = vector.broadcast %cst_52 : f32 to vector<16x16xf32>
    %115 = arith.cmpf oge, %113, %114 : vector<16x16xf32>
    %cst_53 = arith.constant 2.000000e-01 : f32
    %116 = vector.broadcast %cst_53 : f32 to vector<16x16xf32>
    %117 = arith.mulf %116, %113 : vector<16x16xf32>
    %118 = arith.select %115, %113, %117 : vector<16x16xi1>, vector<16x16xf32>
    %cst_54 = arith.constant 0.000000e+00 : f32
    %119 = vector.broadcast %cst_54 : f32 to vector<16x16xf32>
    %120 = arith.cmpf ogt, %3, %119 : vector<16x16xf32>
    %cst_55 = arith.constant -1.000000e+30 : f32
    %121 = vector.broadcast %cst_55 : f32 to vector<16x16xf32>
    %122 = arith.select %120, %118, %121 : vector<16x16xi1>, vector<16x16xf32>
    %cst_56 = arith.constant dense<0xFF800000> : vector<16xf32>
    %123 = vector.multi_reduction <maximumf>, %122, %cst_56 [1] : vector<16x16xf32> to vector<16xf32>
    %124 = vector.shape_cast %123 : vector<16xf32> to vector<16x1xf32>
    %125 = vector.broadcast %124 : vector<16x1xf32> to vector<16x16xf32>
    %126 = arith.subf %122, %125 : vector<16x16xf32>
    %127 = math.exp %126 : vector<16x16xf32>
    %128 = arith.mulf %127, %3 : vector<16x16xf32>
    %cst_57 = arith.constant dense<0.000000e+00> : vector<16xf32>
    %129 = vector.multi_reduction <add>, %128, %cst_57 [1] : vector<16x16xf32> to vector<16xf32>
    %130 = vector.shape_cast %129 : vector<16xf32> to vector<16x1xf32>
    %cst_58 = arith.constant 9.99999968E-21 : f32
    %131 = vector.broadcast %cst_58 : f32 to vector<16x1xf32>
    %132 = arith.maximumf %130, %131 : vector<16x1xf32>
    %133 = tpu.reciprocal %132 {approx = true} : vector<16x1xf32> -> vector<16x1xf32>
    %cst_59 = arith.constant dense<0.000000e+00> : vector<16x128xf32>
    %134 = tpu.matmul %128, %100, %cst_59 {dimension_numbers = #tpu.dot_dimension_numbers<[1], [0], [0], [1], [0, 0, 1, 1], [], []>} : vector<16x16xf32>, vector<16x128xf32>, vector<16x128xf32> -> vector<16x128xf32>
    %135 = vector.broadcast %133 : vector<16x1xf32> to vector<16x128xf32>
    %136 = arith.mulf %134, %135 : vector<16x128xf32>
    %c0_60 = arith.constant 0 : index
    %c128_61 = arith.constant 128 : index
    %137 = vector.load %arg7[%c0_60, %c128_61] : memref<1x256xf32, #tpu.memory_space<vmem>>, vector<1x128xf32>
    %138 = vector.broadcast %137 : vector<1x128xf32> to vector<16x128xf32>
    %139 = arith.addf %136, %138 : vector<16x128xf32>
    %cst_62 = arith.constant 0.000000e+00 : f32
    %140 = vector.broadcast %cst_62 : f32 to vector<16x128xf32>
    %141 = arith.maximumf %139, %140 : vector<16x128xf32>
    %c0_63 = arith.constant 0 : index
    %c128_64 = arith.constant 128 : index
    %142 = vector.load %arg8[%c0_63, %c128_64] : memref<1x256xf32, #tpu.memory_space<vmem>>, vector<1x128xf32>
    %143 = vector.broadcast %142 : vector<1x128xf32> to vector<16x128xf32>
    %144 = arith.mulf %141, %143 : vector<16x128xf32>
    %cst_65 = arith.constant dense<0.000000e+00> : vector<16xf32>
    %145 = vector.multi_reduction <add>, %144, %cst_65 [1] : vector<16x128xf32> to vector<16xf32>
    %146 = vector.shape_cast %145 : vector<16xf32> to vector<16x1xf32>
    %cst_66 = arith.constant dense<0.000000e+00> : vector<1x16xf32>
    %147 = tpu.matmul %142, %141, %cst_66 {dimension_numbers = #tpu.dot_dimension_numbers<[1], [1], [0], [0], [0, 0, 1, 0], [], []>} : vector<1x128xf32>, vector<16x128xf32>, vector<1x16xf32> -> vector<1x16xf32>
    %c1_67 = arith.constant 1 : index
    %c1_68 = arith.constant 1 : index
    %148 = memref.load %arg9[%c1_67, %c1_68] : memref<2x8xf32, #tpu.memory_space<smem>>
    %c1_69 = arith.constant 1 : index
    %c2_70 = arith.constant 2 : index
    %149 = memref.load %arg9[%c1_69, %c2_70] : memref<2x8xf32, #tpu.memory_space<smem>>
    %c1_71 = arith.constant 1 : index
    %c3_72 = arith.constant 3 : index
    %150 = memref.load %arg9[%c1_71, %c3_72] : memref<2x8xf32, #tpu.memory_space<smem>>
    %c1_73 = arith.constant 1 : index
    %c4_74 = arith.constant 4 : index
    %151 = memref.load %arg9[%c1_73, %c4_74] : memref<2x8xf32, #tpu.memory_space<smem>>
    %152 = vector.broadcast %150 : f32 to vector<16x1xf32>
    %153 = arith.mulf %152, %146 : vector<16x1xf32>
    %154 = vector.broadcast %149 : f32 to vector<1x16xf32>
    %155 = arith.mulf %154, %147 : vector<1x16xf32>
    %156 = vector.broadcast %153 : vector<16x1xf32> to vector<16x16xf32>
    %157 = vector.broadcast %155 : vector<1x16xf32> to vector<16x16xf32>
    %158 = arith.addf %156, %157 : vector<16x16xf32>
    %159 = vector.broadcast %148 : f32 to vector<16x16xf32>
    %160 = arith.mulf %5, %159 : vector<16x16xf32>
    %161 = arith.addf %158, %160 : vector<16x16xf32>
    %cst_75 = arith.constant 0.000000e+00 : f32
    %162 = vector.broadcast %cst_75 : f32 to vector<16x16xf32>
    %163 = arith.cmpf oge, %161, %162 : vector<16x16xf32>
    %cst_76 = arith.constant 2.000000e-01 : f32
    %164 = vector.broadcast %cst_76 : f32 to vector<16x16xf32>
    %165 = arith.mulf %164, %161 : vector<16x16xf32>
    %166 = arith.select %163, %161, %165 : vector<16x16xi1>, vector<16x16xf32>
    %cst_77 = arith.constant 0.000000e+00 : f32
    %167 = vector.broadcast %cst_77 : f32 to vector<16x16xf32>
    %168 = arith.cmpf ogt, %3, %167 : vector<16x16xf32>
    %cst_78 = arith.constant -1.000000e+30 : f32
    %169 = vector.broadcast %cst_78 : f32 to vector<16x16xf32>
    %170 = arith.select %168, %166, %169 : vector<16x16xi1>, vector<16x16xf32>
    %cst_79 = arith.constant dense<0xFF800000> : vector<16xf32>
    %171 = vector.multi_reduction <maximumf>, %170, %cst_79 [1] : vector<16x16xf32> to vector<16xf32>
    %172 = vector.shape_cast %171 : vector<16xf32> to vector<16x1xf32>
    %173 = vector.broadcast %172 : vector<16x1xf32> to vector<16x16xf32>
    %174 = arith.subf %170, %173 : vector<16x16xf32>
    %175 = math.exp %174 : vector<16x16xf32>
    %176 = arith.mulf %175, %3 : vector<16x16xf32>
    %cst_80 = arith.constant dense<0.000000e+00> : vector<16xf32>
    %177 = vector.multi_reduction <add>, %176, %cst_80 [1] : vector<16x16xf32> to vector<16xf32>
    %178 = vector.shape_cast %177 : vector<16xf32> to vector<16x1xf32>
    %cst_81 = arith.constant 9.99999968E-21 : f32
    %179 = vector.broadcast %cst_81 : f32 to vector<16x1xf32>
    %180 = arith.maximumf %178, %179 : vector<16x1xf32>
    %181 = tpu.reciprocal %180 {approx = true} : vector<16x1xf32> -> vector<16x1xf32>
    %182 = vector.broadcast %181 : vector<16x1xf32> to vector<16x16xf32>
    %183 = arith.mulf %176, %182 : vector<16x16xf32>
    %cst_82 = arith.constant dense<0.000000e+00> : vector<1x16xf32>
    %184 = tpu.matmul %147, %183, %cst_82 {dimension_numbers = #tpu.dot_dimension_numbers<[1], [1], [0], [0], [0, 0, 1, 0], [], []>} : vector<1x16xf32>, vector<16x16xf32>, vector<1x16xf32> -> vector<1x16xf32>
    %185 = vector.broadcast %151 : f32 to vector<1x16xf32>
    %186 = arith.addf %184, %185 : vector<1x16xf32>
    %c0_83 = arith.constant 0 : index
    %c0_84 = arith.constant 0 : index
    %c0_85 = arith.constant 0 : index
    %187 = vector.load %arg11[%c0_83, %c0_84, %c0_85] : memref<1x1x16xf32, #tpu.memory_space<vmem>>, vector<1x1x16xf32>
    %188 = vector.shape_cast %187 : vector<1x1x16xf32> to vector<1x16xf32>
    %189 = vector.shape_cast %186 : vector<1x16xf32> to vector<1x1x16xf32>
    tpu.vector_store %arg11[%c0_83, %c0_84, %c0_85], %189 {strides = array<i32>} : memref<1x1x16xf32, #tpu.memory_space<vmem>>, vector<1x1x16xf32>,
    return
  }
  func.func @transform_0(%arg0: i32) -> (i32, i32, i32) {
    %c0_i32 = arith.constant 0 : i32
    %c0_i32_0 = arith.constant 0 : i32
    %c0_i32_1 = arith.constant 0 : i32
    return %arg0, %c0_i32, %c0_i32_0 : i32, i32, i32
  }
  func.func @transform_1(%arg0: i32) -> (i32, i32, i32) {
    %c0_i32 = arith.constant 0 : i32
    %c0_i32_0 = arith.constant 0 : i32
    %c0_i32_1 = arith.constant 0 : i32
    return %arg0, %c0_i32, %c0_i32_0 : i32, i32, i32
  }
  func.func @transform_2(%arg0: i32) -> (i32, i32, i32) {
    %c0_i32 = arith.constant 0 : i32
    %c0_i32_0 = arith.constant 0 : i32
    %c0_i32_1 = arith.constant 0 : i32
    return %arg0, %c0_i32, %c0_i32_0 : i32, i32, i32
  }
  func.func @transform_3(%arg0: i32) -> (i32, i32) {
    %c0_i32 = arith.constant 0 : i32
    %c0_i32_0 = arith.constant 0 : i32
    %c0_i32_1 = arith.constant 0 : i32
    return %c0_i32, %c0_i32_0 : i32, i32
  }
  func.func @transform_4(%arg0: i32) -> (i32, i32) {
    %c0_i32 = arith.constant 0 : i32
    %c0_i32_0 = arith.constant 0 : i32
    %c0_i32_1 = arith.constant 0 : i32
    return %c0_i32, %c0_i32_0 : i32, i32
  }
  func.func @transform_5(%arg0: i32) -> (i32, i32) {
    %c0_i32 = arith.constant 0 : i32
    %c0_i32_0 = arith.constant 0 : i32
    %c0_i32_1 = arith.constant 0 : i32
    return %c0_i32, %c0_i32_0 : i32, i32
  }
  func.func @transform_6(%arg0: i32) -> (i32, i32) {
    %c0_i32 = arith.constant 0 : i32
    %c0_i32_0 = arith.constant 0 : i32
    %c0_i32_1 = arith.constant 0 : i32
    return %c0_i32, %c0_i32_0 : i32, i32
  }
  func.func @transform_7(%arg0: i32) -> (i32, i32) {
    %c0_i32 = arith.constant 0 : i32
    %c0_i32_0 = arith.constant 0 : i32
    %c0_i32_1 = arith.constant 0 : i32
    return %c0_i32, %c0_i32_0 : i32, i32
  }
  func.func @transform_8(%arg0: i32) -> (i32, i32) {
    %c0_i32 = arith.constant 0 : i32
    %c0_i32_0 = arith.constant 0 : i32
    %c0_i32_1 = arith.constant 0 : i32
    return %c0_i32, %c0_i32_0 : i32, i32
  }
  func.func @transform_9(%arg0: i32) -> (i32, i32, i32) {
    %c0_i32 = arith.constant 0 : i32
    %c0_i32_0 = arith.constant 0 : i32
    %c0_i32_1 = arith.constant 0 : i32
    return %arg0, %c0_i32, %c0_i32_0 : i32, i32, i32
  }
  func.func @transform_10(%arg0: i32) -> (i32, i32, i32) {
    %c0_i32 = arith.constant 0 : i32
    %c0_i32_0 = arith.constant 0 : i32
    %c0_i32_1 = arith.constant 0 : i32
    return %arg0, %c0_i32, %c0_i32_0 : i32, i32, i32
  }
}

</mosaic_0001>

<bundles_post_ra>
// kernel: custom_policy_and_value_forward.1
= control target key start
LH: loop header
LB: loop body
LE: loop exit
PB: predicated region body
PF: predicated region fallthrough
CT: control target
= control target key end

     0   :  { %s2197_s0 = inlined_call_operand.vmem [shape: f32[2,16,4], index: 0, kind: input, shape index: {}]   ;;  %s2198_s1 = inlined_call_operand.vmem [shape: f32[2,16,16], index: 1, kind: input, shape index: {}]   ;;  %s2199_s2 = inlined_call_operand.vmem [shape: f32[2,16,16], index: 2, kind: input, shape index: {}]   ;;  %s2200_s3 = inlined_call_operand.vmem [shape: f32[4,256], index: 3, kind: input, shape index: {}]   ;;  %s2201_s4 = inlined_call_operand.vmem [shape: f32[2,256], index: 4, kind: input, shape index: {}]   ;;  %s2202_s5 = inlined_call_operand.vmem [shape: f32[2,256], index: 5, kind: input, shape index: {}]   ;;  %s2203_s6 = inlined_call_operand.vmem [shape: f32[1,256], index: 6, kind: input, shape index: {}]   ;;  %s2204_s7 = inlined_call_operand.vmem [shape: f32[1,256], index: 7, kind: input, shape index: {}]   ;;  %s2205_s8 = inlined_call_operand.vmem [shape: f32[2,8], index: 8, kind: input, shape index: {}]   ;;  %s2206_s9 = inlined_call_operand.hbm [shape: f32[2,1,16], index: 9, kind: output, shape index: {0}]   ;;  %s2207_s10 = inlined_call_operand.hbm [shape: f32[2,1,16], index: 10, kind: output, shape index: {1}]  }
   0x1   :  { %2209 = sst [smem:[#allocation11_spill]] %s2197_s0 }
   0x2   :  { %16 = vsyncpa [#allocation4], 0 }
   0x3   :  { %17 = vsyncpa [#allocation3], 0 }
   0x4   :  { %19 = vsyncpa [#allocation3 + $0x1], 0 }
   0x5   :  { %20 = vsyncpa [#allocation7], 0 }
   0x6   :  { %22 = vsyncpa [#allocation7 + $0x1], 0  ;;  %s1890_s13 = smov 0   ;;  %s1892_s14 = smov 0  }
   0x7   :  { %s1894_s15 = smov 0   ;;  %s1896_s16 = smov 0  }
   0x8 LB: > { %s1911_s17 = sadd.s32 4294967295, %s1827_s16   ;;  %s1488_s18 = sadd.s32 4294967294, %s1827_s16   ;;  %s1827_s16 = sphi %s1896_s16, %s2220_s16   ;;  %s1823_s15 = sphi %s1894_s15, %s2219_s15   ;;  %s1819_s14 = sphi %s1892_s14, %s2218_s14   ;;  %s1815_s13 = sphi %s1890_s13, %s2217_s13  }
   0x9   : > { %s1915_s19 = sadd.s32 1, %s1827_s16   ;;  %s239_s20 = sadd.s32 1, %s1823_s15 }
   0xa   : > { %s236_s21 = ssub.s32 %s1827_s16, %s1915_s19  ;;  %p249_p0 = scmp.ne.s32.totalorder %s1823_s15, %s1819_s14 }
   0xb   : > { %p237_p1 = scmp.eq.s32.totalorder %s236_s21, 0  ;;  %p250_p2 = scmp.eq.s32.totalorder %s1911_s17, 1 }
   0xc   : > { %p255_p3 = scmp.ne.s32.totalorder %s1819_s14, %s1815_s13  ;;  %p256_p4 = scmp.eq.s32.totalorder %s1488_s18, 1 }
   0xd   : > { %s1926_s22 = scalar_select %p237_p1, %s1823_s15, %s239_s20  }
   0xe   : > { %p1928_p5 = por %p250_p2, %p249_p0  ;;  %p1932_p6 = por %p256_p4, %p255_p3 }
   0xf   : > { %p1489_p7 = scmp.ge.s32.totalorder %s1827_s16, 1  ;;  %p289_p8 = scmp.lt.s32.totalorder %s1827_s16, 3 }
  0x10   : > { %p1642_p9 = scmp.eq.s32.totalorder %s1911_s17, 0  ;;  %s317_s28 = sshll.u32 %s2205_s8, 4  ;;  %s318_s28 = int_to_ptr.vmem [resolvable:$true] %s317_s28 }
  0x11   : > { %p1939_p10 = pnand %p1489_p7, %p289_p8  ;;  %s1714_s29 = scalar_lea.vmem %s318_s28, 32 }
  0x12   : > { %p1715_p13 = scmp.ne.s32.totalorder %s318_s28, %s1714_s29  ;;  %p1722_p3 = scmp.lt.s32.totalorder %s318_s28, %s318_s28 }
  0x13   : > { %p1631_p11 = pneg %p1939_p10  ;;  %p1723_p4 = scmp.lt.s32.totalorder %s1714_s29, %s1714_s29 }
  0x15   : > { %p1632_p12 = pnand %p1642_p9, %p1631_p11  ;;  %p1724_p7 = por %p1723_p4, %p1722_p3 }
  0x17   : > { %p1716_p0 = pneg %p1632_p12 }
  0x19   : > { %p1717_p1 = pnand %p1716_p0, %p1715_p13 }
  0x1b   : > { %p1718_p2 = pneg %p1717_p1 }
  0x1d   : > { %p1725_p8 = pnand %p1724_p7, %p1718_p2 }
  0x1f   : > { %1728 = shalt.err (!%p1725_p8)
}
  0x20   : > { %s1829_s30 = smov [#allocation2]   ;;  %354 = sbr.rel (%p1939_p10) target bundleno = 2231 (0x8b7), region = 56 }
  0x21   : > { %1634 = dma.vmem_to_smem (!%p1632_p12), %s318_s28, 32, %s1829_s30, [#allocation4]  }
  0x27   : > { %1802 = dma.done.wait (%p1642_p9), [#allocation4], 32  }
  0x28   : > { %1804 = vsyncadd (%p1642_p9), [#allocation4], 4294967264 }
  0x29   : > { %360 = sfence }
  0x2a   : > { %v427_v0 = vld [vmem:[%s2200_s3] sm:$0xff]  ;;  %vm437_vm0 = vcmask 1043456   ;;  %p406_p11 = scmp.lt.s32.totalorder %s1911_s17, 1  ;;  %v1830_v2 = vmov 0.0   ;;  %vm430_vm1 = vcmask 31744   ;;  %s2213_s0 = sld [smem:[#allocation11_spill]]  ;;  %v613_v16 = vlaneseq }
  0x2b   : > { %v429_v1 = vcombine.high %v427_v0, %v427_v0  ;;  %506 = vmatprep.mubr.f32.mxu0 %v1830_v2  ;;  %v1504_v5 = vld.sshfl [vmem:[%s2201_s4] sm:$0x33 pattern:$0x76325410]  ;;  %s612_s11 = sld [smem:[#allocation2]]  ;;  %vm634_vm5 = vcmask 130048  }
  0x2c   : > { %s407_s18 = scalar_select %p406_p11, %s1911_s17, 1  ;;  %v528_v6 = vcombine.high %v1504_v5, %v1504_v5  ;;  %v1505_v7 = vld [vmem:[%s2202_s5] ss:$0 sm:$0xff]  ;;  %v614_v17 = vshrl.u32 %v613_v16, 7  ;;  %v1516_v54 = vld [vmem:[%s2202_s5 + $0x3] ss:$0 sm:$0xff]  ;;  %vm2078_vm12 = vmpackc.low %vm634_vm5, %vm634_vm5 }
  0x2d   : > { %1500 = vmatprep.subr.msk.mxu0 %vm437_vm0, %v429_v1  ;;  %v1831_v60 = vmov 0.0|0.0   ;;  %vm1832_vm7 = vmmov 0   ;;  %s1517_s29 = sld [smem:[#allocation2 + $0x80]]  ;;  %s1509_s25 = sld [smem:[#allocation2 + $0x1]]  ;;  %vm970_vm13 = vcmask 122880  }
  0x2e   : > { %1501 = vmatpush1.msk.msra.mxu0 %vm437_vm0, %v427_v0  ;;  %s1962_s20 = sshll.u32 %s407_s18, 4  ;;  %595 = vmatprep.mubr.f32.mxu1 %v528_v6  ;;  %v1988_v19 = vsub.s32 0, %v614_v17  ;;  %v986_v20 = vsub.s32 1, %v614_v17  ;;  %s1512_s30 = sld [smem:[#allocation2 + $0x4]] }
  0x2f   : > { %s420_s21 = scalar_lea.vmem %s2199_s2, %s1962_s20  ;;  %s415_s27 = scalar_lea.vmem %s2198_s1, %s1962_s20 }
  0x30   : > { %s410_s26 = scalar_lea.vmem %s2213_s0, %s1962_s20  ;;  %v1990_v21 = vld [vmem:[%s420_s21] sm:$0xff]  ;;  %v1992_v22 = vld [vmem:[%s420_s21 + $0x8] sm:$0xff]  ;;  %s1510_s21 = sld [smem:[#allocation2 + $0x2]] }
  0x31   : > { %v421_v3 = vld [vmem:[%s410_s26] sm:$0xff]  ;;  %v422_v4 = vld [vmem:[%s410_s26 + $0x8] sm:$0xff]  ;;  %v619_v23 = vstv %s612_s11  ;;  %s1511_s26 = sld [smem:[#allocation2 + $0x3]]  ;;  %s2097_s11 = sand.u32 1, %s1819_s14  }
  0x32   : > { %1502 = vmatmul.mubr.msk.f32.vlgmr.msra.gmra.mrb[0].mxu0 %vm430_vm1, %v421_v3  ;;  %v620_v26 = vmul.f32 %v619_v23, %v1990_v21  ;;  %v621_v27 = vmul.f32 %v619_v23, %v1992_v22  ;;  %v2003_v31 = vld [vmem:[%s415_s27] sm:$0xff]  ;;  %v2005_v36 = vld [vmem:[%s415_s27 + $0x8] sm:$0xff]  ;;  %s1522_s12 = sld [smem:[#allocation2 + $0x82]]  ;;  %s1521_s18 = sld [smem:[#allocation2 + $0x81]] }
  0x33   : > { %512 = vmatprep.mubr.f32.mxu0 %v1830_v2  ;;  %vm630_vm2 = vcmp.gt.f32.partialorder %v2003_v31, 0.0  ;;  %vm631_vm6 = vcmp.gt.f32.partialorder %v2005_v36, 0.0  ;;  %v990_v62 = vstv %s1517_s29 }
  0x34   : > { %v991_v63 = vmul.f32 %v990_v62, %v1990_v21 }
  0x36   : > { %1503 = vmatmul.mubr.msk.f32.gmra.mrb[2].mxu0 %vm430_vm1, %v422_v4 }
 0x105   : > { %v508_v8 = vpop.f32.mrb[0].mxu0 }
 0x106   : > { %v1975_v9 = vpop.f32.mrb[1].mxu0  ;;  %v606_v10 = vmul.f32 %v1505_v7, %v508_v8 }
 0x107   : > { %v977_v57 = vmul.f32 %v1516_v54, %v1975_v9 }
 0x108   : > { %608 = vadd.xlane.f32.xlu0 %v606_v10 }
 0x109   : > { %v514_v11 = vpop.f32.mrb[2].mxu0 }
 0x10a   : > { %v1599_v12 = vpack.c.bf16 %v514_v11, %v508_v8  ;;  %v1977_v13 = vpop.f32.mrb[3].mxu0  ;;  %v607_v14 = vmul.f32 %v1505_v7, %v514_v11 }
 0x10b   : > { %v1981_v15 = vpack.c.bf16 %v1977_v13, %v1975_v9  ;;  %v978_v59 = vmul.f32 %v1516_v54, %v1977_v13 }
 0x10c   : > { %610 = vadd.xlane.f32.xlu0 %v607_v14  ;;  %1602 = vmatprep.subr.bf16.mxu0 %v1599_v12 }
 0x10d   : > { %1598 = vmatprep.subr.bf16.mxu1 %v1981_v15  ;;  %1604 = vmatpush3.bf16.msra.mxu0 %v1599_v12 }
 0x10e   : > { %1600 = vmatpush1.bf16.xpose.msra.mxu1 %v1599_v12  ;;  %1608 = vmatprep.subr.bf16.mxu0 %v1831_v60 }
 0x10f   : > { %1605 = vmatprep.subr.bf16.mxu1 %v1831_v60 }
 0x115   : > { %596 = vmatmul.mubr.f32.vlgmr.msra.gmra.mrb[0].mxu1 %v1504_v5  ;;  %v992_v5 = vmul.f32 %v990_v62, %v1992_v22 }
 0x116   : > { %1566 = vmatprep.mubr.msk.f32.mxu1 %vm1832_vm7, %v1830_v2 }
 0x195   : > { %v609_v18 = vpop.xlane.xlu0 %608 }
 0x199   : > { %v611_v30 = vpop.xlane.xlu0 %610 }
 0x1e8   : > { %v597_v24 = vpop.f32.mrb[0].mxu1 }
 0x1e9   : > { %v616_v25 = vrot.slane %v597_v24, %v1988_v19  ;;  %v2001_v28 = vrot.slane %v597_v24, %v986_v20  ;;  %v599_v29 = vpop.f32.mrb[1].mxu1 }
 0x1eb   : > { %v617_v32 = vadd.f32 %v616_v25, %v609_v18  ;;  %v618_v33 = vadd.f32 %v616_v25, %v611_v30  ;;  %v1508_v25 = vld [vmem:[%s2203_s6] ss:$0 sm:$0xff] }
 0x1ed   : > { %v622_v34 = vadd.f32 %v620_v26, %v617_v32  ;;  %v623_v35 = vadd.f32 %v621_v27, %v618_v33  ;;  %v753_v26 = vld [vmem:[%s2204_s7] sm:$0x1] }
 0x1ee   : > { %v758_v33 = vrot.slane %v753_v26, %v1988_v19 }
 0x1ef   : > { %vm624_vm3 = vcmp.ge.f32.partialorder %v622_v34, 0.0  ;;  %v626_v37 = vmul.f32 0.2, %v622_v34  ;;  %vm625_vm4 = vcmp.ge.f32.partialorder %v623_v35, 0.0  ;;  %v627_v38 = vmul.f32 0.2, %v623_v35 }
 0x1f1   : > { %v628_v39 = vsel %vm624_vm3, %v622_v34, %v626_v37  ;;  %v629_v40 = vsel %vm625_vm4, %v623_v35, %v627_v38 }
 0x1f2   : > { %v632_v41 = vsel %vm630_vm2, %v628_v39, -1e+30  ;;  %v633_v43 = vsel %vm631_vm6, %v629_v40, -1e+30 }
 0x1f3   : > { %v635_v42 = vsel %vm634_vm5, %v632_v41, -inf  ;;  %v638_v44 = vsel %vm634_vm5, %v633_v43, -inf }
 0x1f4   : > { %636 = vmax.xlane.f32.xlu1 %v635_v42 }
 0x1f8   : > { %639 = vmax.xlane.f32.xlu1 %v638_v44 }
 0x281   : > { %v637_v45 = vpop.xlane.xlu1 %636 }
 0x282   : > { %v641_v46 = vsub.f32 %v632_v41, %v637_v45 }
 0x284   : > { %v643_v47 = vmul.f32 1.442695, %v641_v46 }
 0x285   : > { %v640_v48 = vpop.xlane.xlu1 %639 }
 0x286   : > { %1682 = vpow2.f32 %v643_v47  ;;  %v642_v49 = vsub.f32 %v633_v43, %v640_v48 }
 0x288   : > { %v645_v50 = vmul.f32 1.442695, %v642_v49 }
 0x28a   : > { %1684 = vpow2.f32 %v645_v50 }
 0x290   : > { %v1683_v51 = vpop.eup %1682 }
 0x291   : > { %v647_v52 = vmul.f32 %v1683_v51, %v2003_v31 }
 0x293   : > { %1559 = vmatprep.mubr.msk.f32.mxu0 %vm634_vm5, %v647_v52  ;;  %v649_v53 = vsel %vm634_vm5, %v647_v52, 0.0  ;;  %v851_v52 = vstv %s1509_s25  ;;  %s399_s25 = scalar_lea.vmem [#allocation5], %s2097_s11 }
 0x294   : > { %v1685_v55 = vpop.eup %1684  ;;  %650 = vadd.xlane.f32.xlu0 %v649_v53  ;;  %v840_v53 = vstv %s1511_s26  ;;  %s2208_s26 = sshll.u32 %s1911_s17, 4  ;;  %s1356_s29 = sshll.u32 %s399_s25, 4  ;;  %s1357_s29 = int_to_ptr.vmem [resolvable:$true] %s1356_s29 }
 0x295   : > { %v648_v56 = vmul.f32 %v1685_v55, %v2005_v36  ;;  %s2125_s28 = scalar_lea.hbm %s2206_s9, %s2208_s26 }
 0x297   : > { %1560 = vmatmul.mubr.msk.f32.vlgmr.msra.gmra.mrb[4].mxu0 %vm634_vm5, %v648_v56  ;;  %v652_v58 = vsel %vm634_vm5, %v648_v56, 0.0 }
 0x298   : > { %979 = vadd.xlane.f32.xlu0 %v977_v57  ;;  %653 = vadd.xlane.f32.xlu1 %v652_v58  ;;  %v853_v58 = vmul.f32 %v851_v52, %v1992_v22 }
 0x299   : > { %1573 = vmatprep.mubr.msk.f32.mxu0 %vm1832_vm7, %v1830_v2 }
 0x29c   : > { %981 = vadd.xlane.f32.xlu1 %v978_v59 }
 0x321   : > { %v651_v61 = vpop.xlane.xlu0 %650 }
 0x322   : > { %v655_v20 = vmax.f32 %v651_v61, 1e-20 }
 0x325   : > { %v980_v0 = vpop.xlane.xlu0 %979  ;;  %v654_v1 = vpop.xlane.xlu1 %653 }
 0x326   : > { %v988_v3 = vadd.f32 %v2001_v28, %v980_v0  ;;  %v656_v18 = vmax.f32 %v654_v1, 1e-20 }
 0x328   : > { %v993_v4 = vadd.f32 %v991_v63, %v988_v3  ;;  %1686 = vrcp.f32 %v656_v18  ;;  %v852_v63 = vmul.f32 %v851_v52, %v1990_v21 }
 0x329   : > { %v982_v6 = vpop.xlane.xlu1 %981  ;;  %1688 = vrcp.f32 %v655_v20 }
 0x32a   : > { %v989_v7 = vadd.f32 %v2001_v28, %v982_v6  ;;  %vm995_vm8 = vcmp.ge.f32.partialorder %v993_v4, 0.0  ;;  %v997_v8 = vmul.f32 0.2, %v993_v4 }
 0x32c   : > { %v994_v9 = vadd.f32 %v992_v5, %v989_v7  ;;  %v999_v10 = vsel %vm995_vm8, %v993_v4, %v997_v8 }
 0x32d   : > { %v1001_v11 = vsel %vm630_vm2, %v999_v10, -1e+30 }
 0x32e   : > { %v1003_v12 = vsel %vm634_vm5, %v1001_v11, -inf  ;;  %vm996_vm9 = vcmp.ge.f32.partialorder %v994_v9, 0.0  ;;  %v998_v13 = vmul.f32 0.2, %v994_v9 }
 0x32f   : > { %1004 = vmax.xlane.f32.xlu0 %v1003_v12 }
 0x330   : > { %v1000_v14 = vsel %vm996_vm9, %v994_v9, %v998_v13 }
 0x331   : > { %v1002_v16 = vsel %vm631_vm6, %v1000_v14, -1e+30 }
 0x332   : > { %v1006_v17 = vsel %vm634_vm5, %v1002_v16, -inf  ;;  %v1687_v23 = vpop.eup %1686 }
 0x333   : > { %1007 = vmax.xlane.f32.xlu1 %v1006_v17  ;;  %v1689_v27 = vpop.eup %1688 }
 0x36a   : > { %v1561_v24 = vpop.f32.mrb[4].mxu0 }
 0x36b   : > { %v741_v28 = vmul.f32 %v1687_v23, %v1561_v24  ;;  %v731_v29 = vpop.f32.mrb[5].mxu0 }
 0x36c   : > { %v740_v30 = vmul.f32 %v1689_v27, %v731_v29 }
 0x36d   : > { %v750_v32 = vadd.f32 %v1508_v25, %v741_v28 }
 0x36e   : > { %v749_v34 = vadd.f32 %v1508_v25, %v740_v30 }
 0x36f   : > { %v752_v35 = vmax.f32 %v750_v32, 0.0 }
 0x370   : > { %v751_v37 = vmax.f32 %v749_v34, 0.0 }
 0x371   : > { %v761_v38 = vmul.f32 %v758_v33, %v752_v35 }
 0x372   : > { %v1606_v39 = vpack.c.bf16 %v752_v35, %v751_v37  ;;  %v760_v40 = vmul.f32 %v758_v33, %v751_v37 }
 0x373   : > { %764 = vadd.xlane.f32.xlu1 %v761_v38 }
 0x374   : > { %762 = vadd.xlane.f32.xlu0 %v760_v40  ;;  %1607 = vmatpush3.bf16.xpose.msra.mxu1 %v1606_v39 }
 0x375   : > { %1613 = vmatprep.subr.bf16.mxu1 %v1981_v15 }
 0x37b   : > { %1567 = vmatmul.mubr.f32.vlgmr.msra.gmra.mrb[2].mxu1 %v753_v26 }
 0x37c   : > { %1615 = vmatpush3.bf16.msra.mxu1 %v1981_v15  ;;  %v843_v15 = vstv %s1510_s21  ;;  %s1523_s21 = sld [smem:[#allocation2 + $0x83]] }
 0x37d   : > { %1619 = vmatprep.subr.bf16.mxu1 %v1831_v60 }
 0x3bc   : > { %v1005_v41 = vpop.xlane.xlu0 %1004 }
 0x3bd   : > { %v1009_v42 = vsub.f32 %v1001_v11, %v1005_v41 }
 0x3bf   : > { %v1011_v43 = vmul.f32 1.442695, %v1009_v42 }
 0x3c0   : > { %v1008_v44 = vpop.xlane.xlu1 %1007 }
 0x3c1   : > { %1690 = vpow2.f32 %v1011_v43  ;;  %v1010_v45 = vsub.f32 %v1002_v16, %v1008_v44 }
 0x3c3   : > { %v1013_v46 = vmul.f32 1.442695, %v1010_v45 }
 0x3c5   : > { %1692 = vpow2.f32 %v1013_v46 }
 0x3cb   : > { %v1691_v47 = vpop.eup %1690 }
 0x3cc   : > { %v1015_v48 = vmul.f32 %v1691_v47, %v2003_v31 }
 0x3ce   : > { %1580 = vmatprep.mubr.msk.f32.mxu1 %vm634_vm5, %v1015_v48  ;;  %v1017_v33 = vsel %vm634_vm5, %v1015_v48, 0.0 }
 0x3cf   : > { %v1693_v49 = vpop.eup %1692 }
 0x3d0   : > { %v1016_v50 = vmul.f32 %v1693_v49, %v2005_v36 }
 0x3d2   : > { %1581 = vmatmul.mubr.msk.f32.vlgmr.msra.gmra.mrb[4].mxu1 %vm634_vm5, %v1016_v50  ;;  %v1020_v32 = vsel %vm634_vm5, %v1016_v50, 0.0  ;;  %v1520_v50 = vld [vmem:[%s2203_s6 + $0x1] ss:$0 sm:$0xff] }
 0x3d3   : > { %1594 = vmatprep.mubr.msk.f32.mxu1 %vm1832_vm7, %v1830_v2 }
 0x400   : > { %v765_v51 = vpop.xlane.xlu1 %764 }
 0x401   : > { %v763_v54 = vpop.xlane.xlu0 %762  ;;  %v842_v59 = vmul.f32 %v840_v53, %v765_v51 }
 0x402   : > { %v841_v61 = vmul.f32 %v840_v53, %v763_v54 }
 0x44e   : > { %v2058_v55 = vpop.f32.mrb[2].mxu1 }
 0x44f   : > { %v844_v56 = vmul.f32 %v843_v15, %v2058_v55  ;;  %v1568_v57 = vpop.f32.mrb[3].mxu1  ;;  %v1121_v15 = vld [vmem:[%s2204_s7 + $0x1] sm:$0x1] }
 0x451   : > { %v848_v62 = vrot.slane %v844_v56, %v1988_v19  ;;  %v1126_v56 = vrot.slane %v1121_v15, %v1988_v19 }
 0x453   : > { %v849_v0 = vadd.f32 %v848_v62, %v841_v61  ;;  %v850_v1 = vadd.f32 %v848_v62, %v842_v59 }
 0x455   : > { %v855_v3 = vadd.f32 %v853_v58, %v850_v1  ;;  %v854_v4 = vadd.f32 %v852_v63, %v849_v0 }
 0x457   : > { %vm857_vm10 = vcmp.ge.f32.partialorder %v855_v3, 0.0  ;;  %v859_v5 = vmul.f32 0.2, %v855_v3  ;;  %vm856_vm11 = vcmp.ge.f32.partialorder %v854_v4, 0.0  ;;  %v858_v6 = vmul.f32 0.2, %v854_v4 }
 0x459   : > { %v861_v7 = vsel %vm857_vm10, %v855_v3, %v859_v5  ;;  %v860_v8 = vsel %vm856_vm11, %v854_v4, %v858_v6  ;;  %v1211_v3 = vstv %s1522_s12  ;;  %v1219_v4 = vstv %s1521_s18  ;;  %s1729_s12 = scalar_lea.vmem %s1357_s29, 16  ;;  %s1833_s18 = smov [#allocation5]  }
 0x45a   : > { %v863_v9 = vsel %vm631_vm6, %v861_v7, -1e+30  ;;  %v862_v10 = vsel %vm630_vm2, %v860_v8, -1e+30  ;;  %v1208_v5 = vstv %s1523_s21  ;;  %p1730_p9 = scmp.ne.s32.totalorder %s1357_s29, %s1729_s12  ;;  %s1733_s21 = sshll.u32 %s1833_s18, 4  ;;  %s1734_s21 = int_to_ptr.vmem [resolvable:$false] %s1733_s21 }
 0x45b   : > { %v867_v11 = vsel %vm634_vm5, %v863_v9, -inf  ;;  %v864_v12 = vsel %vm634_vm5, %v862_v10, -inf  ;;  %s1735_s0 = scalar_lea.vmem %s1734_s21, 32  ;;  %p1736_p13 = scmp.lt.s32.totalorder %s1357_s29, %s1734_s21 }
 0x45c   : > { %868 = vmax.xlane.f32.xlu1 %v867_v11  ;;  %865 = vmax.xlane.f32.xlu0 %v864_v12  ;;  %p1731_p10 = pnand %p1730_p9, %p1928_p5  ;;  %p1737_p0 = scmp.lt.s32.totalorder %s1735_s0, %s1729_s12 }
 0x45e   : > { %p1732_p12 = pneg %p1731_p10  ;;  %p1738_p1 = por %p1737_p0, %p1736_p13 }
 0x460   : > { %p1739_p2 = pnand %p1738_p1, %p1732_p12 }
 0x4a5   : > { %v1582_v13 = vpop.f32.mrb[4].mxu1 }
 0x4a6   : > { %v1099_v14 = vpop.f32.mrb[5].mxu1 }
 0x4e9   : > { %v869_v16 = vpop.xlane.xlu1 %868  ;;  %v866_v17 = vpop.xlane.xlu0 %865 }
 0x4ea   : > { %v871_v18 = vsub.f32 %v863_v9, %v869_v16  ;;  %v870_v20 = vsub.f32 %v862_v10, %v866_v17  ;;  %v1221_v10 = vmul.f32 %v1219_v4, %v1992_v22 }
 0x4ec   : > { %v874_v23 = vmul.f32 1.442695, %v871_v18  ;;  %v872_v24 = vmul.f32 1.442695, %v870_v20 }
 0x4ee   : > { %1694 = vpow2.f32 %v874_v23 }
 0x4ef   : > { %1696 = vpow2.f32 %v872_v24 }
 0x4f8   : > { %v1695_v25 = vpop.eup %1694 }
 0x4f9   : > { %v1697_v26 = vpop.eup %1696  ;;  %v877_v27 = vmul.f32 %v1695_v25, %v2005_v36 }
 0x4fa   : > { %v876_v28 = vmul.f32 %v1697_v26, %v2003_v31 }
 0x4fb   : > { %v881_v29 = vsel %vm634_vm5, %v877_v27, 0.0 }
 0x4fc   : > { %882 = vadd.xlane.f32.xlu1 %v881_v29  ;;  %v878_v30 = vsel %vm634_vm5, %v876_v28, 0.0 }
 0x4fd   : > { %879 = vadd.xlane.f32.xlu0 %v878_v30 }
 0x500   : > { %1021 = vadd.xlane.f32.xlu1 %v1020_v32 }
 0x501   : > { %1018 = vadd.xlane.f32.xlu0 %v1017_v33 }
 0x589   : > { %v883_v34 = vpop.xlane.xlu1 %882 }
 0x58a   : > { %v885_v35 = vmax.f32 %v883_v34, 1e-20  ;;  %v880_v37 = vpop.xlane.xlu0 %879 }
 0x58b   : > { %v884_v38 = vmax.f32 %v880_v37, 1e-20 }
 0x58c   : > { %1698 = vrcp.f32 %v885_v35 }
 0x58d   : > { %1700 = vrcp.f32 %v884_v38  ;;  %v1022_v39 = vpop.xlane.xlu1 %1021 }
 0x58e   : > { %v1024_v40 = vmax.f32 %v1022_v39, 1e-20  ;;  %v1019_v41 = vpop.xlane.xlu0 %1018 }
 0x58f   : > { %v1023_v42 = vmax.f32 %v1019_v41, 1e-20 }
 0x590   : > { %1702 = vrcp.f32 %v1024_v40 }
 0x591   : > { %1704 = vrcp.f32 %v1023_v42 }
 0x596   : > { %v1699_v43 = vpop.eup %1698 }
 0x597   : > { %v1701_v44 = vpop.eup %1700  ;;  %v889_v45 = vmul.f32 %v1699_v43, %v877_v27 }
 0x598   : > { %v888_v46 = vmul.f32 %v1701_v44, %v876_v28 }
 0x59a   : > { %v1703_v48 = vpop.eup %1702  ;;  %v1609_v49 = vpack.c.bf16 %v889_v45, %v888_v46 }
 0x59b   : > { %v1705_v51 = vpop.eup %1704  ;;  %v1109_v52 = vmul.f32 %v1703_v48, %v1582_v13 }
 0x59c   : > { %1611 = vmatpush3.bf16.xpose.msk.msra.mxu0 %vm2078_vm12, %v1609_v49  ;;  %v1108_v53 = vmul.f32 %v1705_v51, %v1099_v14  ;;  %v1220_v14 = vmul.f32 %v1219_v4, %v1990_v21 }
 0x59d   : > { %1616 = vmatprep.subr.bf16.mxu0 %v1831_v60  ;;  %v1118_v54 = vadd.f32 %v1520_v50, %v1109_v52  ;;  %v890_v60 = vstv %s1512_s30  ;;  %s1340_s30 = scalar_lea.sflag [#allocation3], %s2097_s11 }
 0x59e   : > { %v1117_v57 = vadd.f32 %v1520_v50, %v1108_v53 }
 0x59f   : > { %v1120_v58 = vmax.f32 %v1118_v54, 0.0 }
 0x5a0   : > { %v1119_v59 = vmax.f32 %v1117_v57, 0.0 }
 0x5a1   : > { %v1129_v61 = vmul.f32 %v1126_v56, %v1120_v58 }
 0x5a2   : > { %v1617_v62 = vpack.c.bf16 %v1120_v58, %v1119_v59  ;;  %v1128_v63 = vmul.f32 %v1126_v56, %v1119_v59 }
 0x5a3   : > { %1574 = vmatmul.mubr.msk.f32.vlgmr.msra.gmra.mrb[6].mxu0 %vm634_vm5, %v2058_v55  ;;  %1132 = vadd.xlane.f32.xlu1 %v1129_v61 }
 0x5a4   : > { %1618 = vmatpush3.bf16.xpose.msra.mxu0 %v1617_v62  ;;  %1130 = vadd.xlane.f32.xlu0 %v1128_v63 }
 0x5a5   : > { %1587 = vmatprep.mubr.msk.f32.mxu0 %vm1832_vm7, %v1830_v2 }
 0x5ab   : > { %1588 = vmatmul.mubr.f32.vlgmr.msra.gmra.mrb[8].mxu0 %v1121_v15 }
 0x630   : > { %v1133_v2 = vpop.xlane.xlu1 %1132 }
 0x631   : > { %v1131_v6 = vpop.xlane.xlu0 %1130  ;;  %v1210_v11 = vmul.f32 %v1208_v5, %v1133_v2 }
 0x632   : > { %v1209_v12 = vmul.f32 %v1208_v5, %v1131_v6 }
 0x676   : > { %v966_v0 = vpop.f32.mrb[6].mxu0 }
 0x677   : > { %v967_v1 = vadd.f32 %v966_v0, %v890_v60  ;;  %v1575_v55 = vpop.f32.mrb[7].mxu0 }
 0x679   : > { %971 = vst.msk [vmem:[%s399_s25] sm:$0x1] %vm970_vm13, %v967_v1 }
 0x67e   : > { %v1200_v7 = vpop.f32.mrb[8].mxu0 }
 0x67f   : > { %v1212_v8 = vmul.f32 %v1211_v3, %v1200_v7  ;;  %v1589_v9 = vpop.f32.mrb[9].mxu0 }
 0x681   : > { %v1216_v13 = vrot.slane %v1212_v8, %v1988_v19 }
 0x683   : > { %v1217_v16 = vadd.f32 %v1216_v13, %v1209_v12  ;;  %v1218_v17 = vadd.f32 %v1216_v13, %v1210_v11 }
 0x685   : > { %v1223_v18 = vadd.f32 %v1221_v10, %v1218_v17  ;;  %v1222_v20 = vadd.f32 %v1220_v14, %v1217_v16 }
 0x687   : > { %vm1225_vm14 = vcmp.ge.f32.partialorder %v1223_v18, 0.0  ;;  %v1227_v23 = vmul.f32 0.2, %v1223_v18  ;;  %vm1224_vm15 = vcmp.ge.f32.partialorder %v1222_v20, 0.0  ;;  %v1226_v24 = vmul.f32 0.2, %v1222_v20 }
 0x689   : > { %v1229_v25 = vsel %vm1225_vm14, %v1223_v18, %v1227_v23  ;;  %v1228_v26 = vsel %vm1224_vm15, %v1222_v20, %v1226_v24 }
 0x68a   : > { %v1231_v27 = vsel %vm631_vm6, %v1229_v25, -1e+30  ;;  %v1230_v22 = vsel %vm630_vm2, %v1228_v26, -1e+30 }
 0x68b   : > { %v1235_v19 = vsel %vm634_vm5, %v1231_v27, -inf  ;;  %v1232_v21 = vsel %vm634_vm5, %v1230_v22, -inf }
 0x68c   : > { %1236 = vmax.xlane.f32.xlu1 %v1235_v19  ;;  %1233 = vmax.xlane.f32.xlu0 %v1232_v21 }
 0x719   : > { %v1237_v28 = vpop.xlane.xlu1 %1236  ;;  %v1234_v29 = vpop.xlane.xlu0 %1233 }
 0x71a   : > { %v1239_v30 = vsub.f32 %v1231_v27, %v1237_v28  ;;  %v1238_v32 = vsub.f32 %v1230_v22, %v1234_v29 }
 0x71c   : > { %v1242_v33 = vmul.f32 1.442695, %v1239_v30  ;;  %v1240_v34 = vmul.f32 1.442695, %v1238_v32 }
 0x71e   : > { %1706 = vpow2.f32 %v1242_v33 }
 0x71f   : > { %1708 = vpow2.f32 %v1240_v34 }
 0x728   : > { %v1707_v35 = vpop.eup %1706 }
 0x729   : > { %v1709_v37 = vpop.eup %1708  ;;  %v1245_v38 = vmul.f32 %v1707_v35, %v2005_v36 }
 0x72a   : > { %v1244_v39 = vmul.f32 %v1709_v37, %v2003_v31 }
 0x72b   : > { %v1249_v40 = vsel %vm634_vm5, %v1245_v38, 0.0 }
 0x72c   : > { %1250 = vadd.xlane.f32.xlu1 %v1249_v40  ;;  %v1246_v41 = vsel %vm634_vm5, %v1244_v39, 0.0 }
 0x72d   : > { %1247 = vadd.xlane.f32.xlu0 %v1246_v41 }
 0x7b9   : > { %v1251_v42 = vpop.xlane.xlu1 %1250 }
 0x7ba   : > { %v1253_v43 = vmax.f32 %v1251_v42, 1e-20  ;;  %v1248_v44 = vpop.xlane.xlu0 %1247 }
 0x7bb   : > { %v1252_v45 = vmax.f32 %v1248_v44, 1e-20 }
 0x7bc   : > { %1710 = vrcp.f32 %v1253_v43 }
 0x7bd   : > { %1712 = vrcp.f32 %v1252_v45 }
 0x7c6   : > { %v1711_v36 = vpop.eup %1710 }
 0x7c7   : > { %v1713_v46 = vpop.eup %1712  ;;  %v1257_v31 = vmul.f32 %v1711_v36, %v1245_v38 }
 0x7c8   : > { %v1256_v48 = vmul.f32 %v1713_v46, %v1244_v39 }
 0x7ca   : > { %v1620_v49 = vpack.c.bf16 %v1257_v31, %v1256_v48 }
 0x7cc   : > { %1622 = vmatpush3.bf16.xpose.msk.msra.mxu1 %vm2078_vm12, %v1620_v49 }
 0x7d3   : > { %1595 = vmatmul.mubr.msk.f32.vlgmr.msra.gmra.mrb[6].mxu1 %vm634_vm5, %v1200_v7 }
 0x7d4   : > { %1742 = shalt.err (!%p1739_p2)
}
 0x7d5   : > { %s1743_s25 = scalar_lea.hbm %s2125_s28, 16  ;;  %s1747_s18 = scalar_lea.hbm %s2206_s9, 32 }
 0x7d6   : > { %p1744_p3 = scmp.ne.s32.totalorder %s2125_s28, %s1743_s25  ;;  %p1748_p8 = scmp.lt.u32.totalorder %s2125_s28, %s2206_s9 }
 0x7d7   : > { %p1749_p11 = scmp.lt.u32.totalorder %s1747_s18, %s1743_s25  ;;  %p1751_p10 = scmp.lt.u32.totalorder %s1743_s25, %s2125_s28 }
 0x7d8   : > { %p1745_p4 = pnand %p1744_p3, %p1928_p5 }
 0x7d9   : > { %p1750_p9 = por %p1749_p11, %p1748_p8 }
 0x7da   : > { %p1746_p7 = pneg %p1745_p4 }
 0x7db   : > { %p1752_p12 = por %p1751_p10, %p1750_p9 }
 0x7dd   : > { %p1753_p13 = pnand %p1752_p12, %p1746_p7 }
 0x7df   : > { %1756 = shalt.err (!%p1753_p13)
}
 0x7e0   : > { %1627 = dma.vmem_to_hbm [thread:$0]  (%p1928_p5), %s1357_s29, 16, %s2125_s28, %s1340_s30  }
 0x7e1   : > { %s1524_s0 = sld [smem:[#allocation2 + $0x84]]  ;;  %s405_s12 = scalar_lea.vmem [#allocation6], %s2097_s11 }
 0x7e2   : > { %s1369_s27 = sshll.u32 %s405_s12, 4  ;;  %s2216_s26 = sshll.u32 %s1911_s17, 4  ;;  %s2155_s27 = int_to_ptr.vmem [resolvable:$true] %s1369_s27 }
 0x7e3   : > { %s2153_s18 = scalar_lea.hbm %s2207_s10, %s2216_s26  ;;  %s1344_s28 = scalar_lea.sflag [#allocation7], %s2097_s11 }
 0x7e4   : > { %s1757_s29 = scalar_lea.vmem %s2155_s27, 16  ;;  %s1834_s30 = smov [#allocation6]  }
 0x7e5   : > { %p1758_p0 = scmp.ne.s32.totalorder %s2155_s27, %s1757_s29  ;;  %s1761_s17 = sshll.u32 %s1834_s30, 4  ;;  %s1762_s17 = int_to_ptr.vmem [resolvable:$false] %s1761_s17 }
 0x7e6   : > { %s1763_s21 = scalar_lea.vmem %s1762_s17, 32  ;;  %p1764_p3 = scmp.lt.s32.totalorder %s2155_s27, %s1762_s17 }
 0x7e7   : > { %v1258_v47 = vstv %s1524_s0  ;;  %p1759_p1 = pnand %p1758_p0, %p1928_p5  ;;  %p1765_p4 = scmp.lt.s32.totalorder %s1763_s21, %s1757_s29 }
 0x7e9   : > { %p1760_p2 = pneg %p1759_p1  ;;  %p1766_p7 = por %p1765_p4, %p1764_p3 }
 0x7eb   : > { %p1767_p8 = pnand %p1766_p7, %p1760_p2 }
 0x8a6   : > { %v1334_v50 = vpop.f32.mrb[6].mxu1 }
 0x8a7   : > { %v1335_v15 = vadd.f32 %v1334_v50, %v1258_v47  ;;  %v1596_v51 = vpop.f32.mrb[7].mxu1 }
 0x8a9   : > { %1338 = vst.msk [vmem:[%s405_s12] sm:$0x1] %vm970_vm13, %v1335_v15 }
 0x8aa   : > { %1770 = shalt.err (!%p1767_p8)
}
 0x8ab   : > { %s1771_s11 = scalar_lea.hbm %s2153_s18, 16  ;;  %s1775_s26 = scalar_lea.hbm %s2207_s10, 32 }
 0x8ac   : > { %p1772_p11 = scmp.ne.s32.totalorder %s2153_s18, %s1771_s11  ;;  %p1776_p12 = scmp.lt.u32.totalorder %s2153_s18, %s2207_s10 }
 0x8ad   : > { %p1777_p13 = scmp.lt.u32.totalorder %s1775_s26, %s1771_s11  ;;  %p1779_p1 = scmp.lt.u32.totalorder %s1771_s11, %s2153_s18 }
 0x8ae   : > { %p1773_p9 = pnand %p1772_p11, %p1928_p5 }
 0x8af   : > { %p1778_p0 = por %p1777_p13, %p1776_p12 }
 0x8b0   : > { %p1774_p10 = pneg %p1773_p9 }
 0x8b1   : > { %p1780_p2 = por %p1779_p1, %p1778_p0 }
 0x8b3   : > { %p1781_p3 = pnand %p1780_p2, %p1774_p10 }
 0x8b5   : > { %1784 = shalt.err (!%p1781_p3)
}
 0x8b6   : > { %1628 = dma.vmem_to_hbm [thread:$0]  (%p1928_p5), %s2155_s27, 16, %s2153_s18, %s1344_s28  }
 0x8b7 PF: > { %p1644_p4 = scmp.ge.s32.totalorder %s1827_s16, 2  ;;  %s1381_s29 = sand.u32 1, %s1815_s13  }
 0x8b8   : > { %s1382_s30 = scalar_lea.sflag [#allocation3], %s1381_s29 }
 0x8b9   : > { %p1636_p7 = pnand %p1644_p4, %p1932_p6 }
 0x8bb   : > { %1806 = dma.done.wait (!%p1636_p7), %s1382_s30, 16  }
 0x8bc   : > { %1808 = vsyncadd (!%p1636_p7), %s1382_s30, 4294967280  ;;  %s1390_s17 = scalar_lea.sflag [#allocation7], %s1381_s29 }
 0x8bd   : > { %1810 = dma.done.wait (!%p1636_p7), %s1390_s17, 16  }
 0x8be   : > { %1812 = vsyncadd (!%p1636_p7), %s1390_s17, 4294967280  ;;  %p25_p5 = scmp.ge.s32.totalorder %s1915_s19, 4   ;;  %s2217_s13 = smov %s1819_s14 }
 0x8bf   : > { %s2218_s14 = smov %s1823_s15  ;;  %s2219_s15 = smov %s1926_s22 }
 0x8c0   : > { %s2220_s16 = smov %s1915_s19  ;;  %27 = sbr.rel (!%p25_p5) target bundleno = 8 (0x8), region = 119 }
 0x8c7   :  { %1394 = vsyncpa [#allocation3], 1 }
 0x8c8   :  { %1396 = vsyncpa [#allocation3 + $0x1], 1 }
 0x8c9   :  { %1397 = vsyncpa [#allocation7], 1 }
 0x8ca   :  { %1399 = vsyncpa [#allocation7 + $0x1], 1 }
 0x8cb   :  { %1400 = vsyncpa [#allocation4], 1 }
 0x8cc   :  { %1402 = vsyncpa [#allocation4 + $0x1], 1 }

</bundles_post_ra>
